<compile_context>
chip_gen: v7x
topology: tpu7x:2x2x1
jax: 0.10.0
libtpu: 0.0.40
codegen_flags: <defaults>
</compile_context>

<pallas_src>
import functools

import jax
import jax.numpy as jnp
from jax import lax
from jax.experimental import pallas as pl
from jax.experimental.pallas import tpu as pltpu

EPS = 1e-12      # matches torch.nn.functional.normalize default eps
SCALER = 10.0

_LANE = 128
_SUBLANE = 8


def _round_up(n, m):
    return ((n + m - 1) // m) * m


def _device_defaults():
    """Per-generation (row-tile cap, scoped-VMEM budget bytes, tensorcores/chip)."""
    try:
        kind = jax.devices()[0].device_kind.lower()
    except Exception:
        kind = ""
    if "v7" in kind:                       # 64 MiB physical VMEM per TC, 2 TCs/chip
        return 512, 48 << 20, 2
    if "v6" in kind:                       # 128 MiB physical VMEM
        return 1024, 100 << 20, 1
    if "v5 lite" in kind or "v5e" in kind:  # 128 MiB physical, 16 MiB scoped default
        return 512, 64 << 20, 1
    return 512, 32 << 20, 1                # conservative fallback


def _choose_kp(K):
    """Lane-pad K only when it is cheap; otherwise keep the full-dim block."""
    if K % _LANE == 0 or K < _LANE:
        return K
    kp = _round_up(K, _LANE)
    return kp if (kp - K) * 8 <= K else K   # pad only if overhead <= 12.5%


def _choose_tile(rows, C, Kp, itemsize):
    tl_cap, vmem_budget, n_cores = _device_defaults()

    # Near-even row tiles so the cdiv grid's remainder tile is small.
    tl = min(tl_cap,
             _round_up(pl.cdiv(rows, max(1, pl.cdiv(rows, tl_cap))), _SUBLANE))
    # Keep >=2 parallel grid steps on multi-TensorCore parts so both cores work.
    if n_cores > 1 and rows > _SUBLANE and tl >= rows:
        tl = _round_up(pl.cdiv(rows, 2), _SUBLANE)

    c_lanes = _round_up(C, _LANE)
    k_lanes = _round_up(Kp, _LANE)

    def vmem_needed(t):
        return (2 * t * c_lanes * itemsize          # double-buffered x tile
                + 2 * t * k_lanes * itemsize        # double-buffered out tile
                + 2 * _round_up(C, _SUBLANE) * k_lanes * itemsize)  # weight slab(s)

    while tl > _SUBLANE and vmem_needed(tl) > vmem_budget:
        tl = max(_SUBLANE, _round_up(tl // 2, _SUBLANE))

    vmem_limit = int(min(vmem_budget, max(2 * vmem_needed(tl), 16 << 20)))
    return tl, vmem_limit


def _cosine_kernel(x_ref, wn_ref, o_ref, *, rows, tl):
    # x_ref:  (TL, C)  one row tile of the flattened (B*L, C) input, input dtype
    # wn_ref: (C, Kp)  pre-L2-normalized weights, contraction dim first
    # o_ref:  (TL, Kp)
    x = x_ref[...]

    # MXU matmul in the input dtype, f32 accumulation.
    sim = jnp.dot(x, wn_ref[...], preferred_element_type=jnp.float32)   # (TL, Kp)

    # Row L2 norms in f32; normalization + 10x scale fused into one multiply.
    # rsqrt(max(sumsq, eps^2)) == 1/max(||x||, eps) since sumsq >= 0; goes to EUP.
    xf = x.astype(jnp.float32)
    sumsq = jnp.sum(xf * xf, axis=-1, keepdims=True)                    # (TL, 1)
    inv = lax.rsqrt(jnp.maximum(sumsq, EPS * EPS))

    out = sim * (SCALER * inv)

    if rows % tl != 0:
        # cdiv grid: the last tile reads past the array (unspecified data).
        # Zero those rows; their stores are dropped anyway, this just keeps
        # NaN/inf out of the discarded values.
        ridx = pl.program_id(0) * tl + lax.broadcasted_iota(jnp.int32, out.shape, 0)
        out = jnp.where(ridx < rows, out, 0.0)

    o_ref[...] = out.astype(o_ref.dtype)


def prepare_weights(w_cat, dtype=jnp.float32):
    """Hoisted weight prep: L2-normalize rows of (K, C), transpose to (C, Kp).

    Weights are static at inference — call this once and reuse the result so
    the pallas_call is the only thing on the hot path.
    """
    K, C = w_cat.shape
    w32 = w_cat.astype(jnp.float32)
    wn = w32 / jnp.maximum(jnp.linalg.norm(w32, axis=-1, keepdims=True), EPS)
    Kp = _choose_kp(K)
    wn_t = wn.T.astype(dtype)                      # (C, K)
    if Kp != K:
        wn_t = jnp.pad(wn_t, ((0, 0), (0, Kp - K)))
    return wn_t                                    # (C, Kp)


def cosine_classifier_apply(x, wn_t, num_classes):
    """x: (B, L, C); wn_t: prepared (C, Kp) weights; -> (B, L, num_classes)."""
    B, L, C = x.shape
    Cw, Kp = wn_t.shape
    assert Cw == C, (Cw, C)
    rows = B * L
    itemsize = jnp.dtype(x.dtype).itemsize

    x2 = x.reshape(rows, C)                        # contiguous reshape: no copy
    tl, vmem_limit = _choose_tile(rows, C, Kp, itemsize)
    n_tiles = pl.cdiv(rows, tl)

    cost = pl.CostEstimate(
        flops=2 * rows * C * Kp,
        transcendentals=rows,
        bytes_accessed=(rows * C + C * Kp + rows * Kp) * itemsize,
    )

    kernel = functools.partial(_cosine_kernel, rows=rows, tl=tl)

    def build(weight_single_buffered):
        # The weight slab is grid-invariant; single-buffer it to save VMEM
        # (matters most on v7x's 64 MiB VMEM).
        w_kwargs = ({"pipeline_mode": pl.Buffered(1)}
                    if weight_single_buffered else {})
        return pl.pallas_call(
            kernel,
            out_shape=jax.ShapeDtypeStruct((rows, Kp), x.dtype),
            grid_spec=pltpu.PrefetchScalarGridSpec(
                num_scalar_prefetch=0,
                grid=(n_tiles,),
                in_specs=[
                    pl.BlockSpec((tl, C), lambda i: (i, 0)),
                    pl.BlockSpec((C, Kp), lambda i: (0, 0), **w_kwargs),
                ],
                out_specs=pl.BlockSpec((tl, Kp), lambda i: (i, 0)),
            ),
            compiler_params=pltpu.CompilerParams(
                dimension_semantics=("parallel",),
                vmem_limit_bytes=vmem_limit,
            ),
            cost_estimate=cost,
        )

    try:
        out2 = build(True)(x2, wn_t)
    except Exception:
        # Fallback if single-buffered pipeline_mode is rejected by this jax build.
        out2 = build(False)(x2, wn_t)

    out = out2.reshape(B, L, Kp)
    if Kp != num_classes:
        out = out[:, :, :num_classes]              # only when K was lane-padded
    return out


def cosine_classifier(x, w_cat):
    """Convenience path: w_cat is the (K, C) concat of per-head conv1d weights."""
    K = w_cat.shape[0]
    wn_t = prepare_weights(w_cat, dtype=x.dtype)
    return cosine_classifier_apply(x, wn_t, K)


def reference(x, w_cat):
    x32 = x.astype(jnp.float32)
    w32 = w_cat.astype(jnp.float32)
    xn = x32 / jnp.maximum(jnp.linalg.norm(x32, axis=-1, keepdims=True), EPS)
    wn = w32 / jnp.maximum(jnp.linalg.norm(w32, axis=-1, keepdims=True), EPS)
    return SCALER * jnp.einsum("blc,kc->blk", xn, wn)


# TODO(synk): init_weight() is a stateful training-time weight assignment, not
# part of the forward pass; it is intentionally not translated.

if __name__ == "__main__":
    # Small shapes consistent with the module.
    classes = [4, 3, 5]          # per-head number of classes (K = 12)
    channels = 32                # nn.Conv1d(channels, c, 1) in_channels
    B, L = 2, 8                  # batch, sequence length (queries)

    key = jax.random.PRNGKey(0)
    kx, kw = jax.random.split(key)
    x = jax.random.normal(kx, (B, L, channels), dtype=jnp.float32)

    # Deterministic per-head conv weights (c_i, channels, 1) -> squeeze & concat.
    w_keys = jax.random.split(kw, len(classes))
    w_heads = [
        jax.random.normal(k, (c, channels, 1), dtype=jnp.float32)
        for k, c in zip(w_keys, classes)
    ]
    w_cat = jnp.concatenate([w[:, :, 0] for w in w_heads], axis=0)   # (K, C)

    # Weight prep hoisted off the hot path (static at inference).
    wn_t = prepare_weights(w_cat, dtype=x.dtype)
    jax.block_until_ready(wn_t)

    out = cosine_classifier_apply(x, wn_t, sum(classes))
    jax.block_until_ready(out)

    ref = reference(x, w_cat)
    assert out.shape == (B, L, sum(classes)), out.shape
    assert jnp.allclose(out, ref, atol=1e-4, rtol=1e-4), float(
        jnp.max(jnp.abs(out - ref)))

    print("KERNEL_OK")
</pallas_src>

<mosaic_0001>
module attributes {stable_mosaic.version = 11 : i64} {
  func.func @_cosine_kernel(%arg0: i32, %arg1: memref<16x32xf32, #tpu.memory_space<vmem>>, %arg2: memref<32x12xf32, #tpu.memory_space<vmem>>, %arg3: memref<16x12xf32, #tpu.memory_space<vmem>>) attributes {dimension_semantics = [#tpu.dimension_semantics<parallel>], iteration_bounds = array<i64: 1>, scalar_prefetch = 0 : i64, scratch_operands = 0 : i64, tpu.core_type = #tpu.core_type<tc>, window_params = [{transform_indices = @transform_0, window_bounds = array<i64: 16, 32>}, {pipeline_mode = #tpu.pipeline_mode<synchronous>, transform_indices = @transform_1, window_bounds = array<i64: 32, 12>}, {transform_indices = @transform_2, window_bounds = array<i64: 16, 12>}]} {
    %c0 = arith.constant 0 : index
    %c0_0 = arith.constant 0 : index
    %0 = vector.load %arg1[%c0, %c0_0] : memref<16x32xf32, #tpu.memory_space<vmem>>, vector<16x32xf32>
    %c0_1 = arith.constant 0 : index
    %c0_2 = arith.constant 0 : index
    %1 = vector.load %arg2[%c0_1, %c0_2] : memref<32x12xf32, #tpu.memory_space<vmem>>, vector<32x12xf32>
    %cst = arith.constant dense<0.000000e+00> : vector<16x12xf32>
    %2 = tpu.matmul %0, %1, %cst {dimension_numbers = #tpu.dot_dimension_numbers<[1], [0], [0], [1], [0, 0, 1, 1], [], []>} : vector<16x32xf32>, vector<32x12xf32>, vector<16x12xf32> -> vector<16x12xf32>
    %3 = arith.mulf %0, %0 : vector<16x32xf32>
    %cst_3 = arith.constant dense<0.000000e+00> : vector<16xf32>
    %4 = vector.multi_reduction <add>, %3, %cst_3 [1] : vector<16x32xf32> to vector<16xf32>
    %5 = vector.shape_cast %4 : vector<16xf32> to vector<16x1xf32>
    %cst_4 = arith.constant 1.000000e-24 : f32
    %6 = vector.broadcast %cst_4 : f32 to vector<16x1xf32>
    %7 = arith.maximumf %5, %6 : vector<16x1xf32>
    %8 = math.rsqrt %7 : vector<16x1xf32>
    %cst_5 = arith.constant 1.000000e+01 : f32
    %9 = vector.broadcast %cst_5 : f32 to vector<16x1xf32>
    %10 = arith.mulf %9, %8 : vector<16x1xf32>
    %11 = vector.broadcast %10 : vector<16x1xf32> to vector<16x12xf32>
    %12 = arith.mulf %2, %11 : vector<16x12xf32>
    %c0_6 = arith.constant 0 : index
    %c0_7 = arith.constant 0 : index
    %13 = vector.load %arg3[%c0_6, %c0_7] : memref<16x12xf32, #tpu.memory_space<vmem>>, vector<16x12xf32>
    tpu.vector_store %arg3[%c0_6, %c0_7], %12 {strides = array<i32>} : memref<16x12xf32, #tpu.memory_space<vmem>>, vector<16x12xf32>,
    return
  }
  func.func @transform_0(%arg0: i32) -> (i32, i32) {
    %c0_i32 = arith.constant 0 : i32
    %c0_i32_0 = arith.constant 0 : i32
    return %arg0, %c0_i32 : i32, i32
  }
  func.func @transform_1(%arg0: i32) -> (i32, i32) {
    %c0_i32 = arith.constant 0 : i32
    %c0_i32_0 = arith.constant 0 : i32
    %c0_i32_1 = arith.constant 0 : i32
    return %c0_i32, %c0_i32_0 : i32, i32
  }
  func.func @transform_2(%arg0: i32) -> (i32, i32) {
    %c0_i32 = arith.constant 0 : i32
    %c0_i32_0 = arith.constant 0 : i32
    return %arg0, %c0_i32 : i32, i32
  }
}

module attributes {stable_mosaic.version = 11 : i64} {
  func.func @_cosine_kernel(%arg0: i32, %arg1: memref<16x32xf32, #tpu.memory_space<vmem>>, %arg2: memref<32x12xf32, #tpu.memory_space<vmem>>, %arg3: memref<16x12xf32, #tpu.memory_space<vmem>>) attributes {dimension_semantics = [#tpu.dimension_semantics<parallel>], iteration_bounds = array<i64: 1>, scalar_prefetch = 0 : i64, scratch_operands = 0 : i64, tpu.core_type = #tpu.core_type<tc>, window_params = [{transform_indices = @transform_0, window_bounds = array<i64: 16, 32>}, {pipeline_mode = #tpu.pipeline_mode<synchronous>, transform_indices = @transform_1, window_bounds = array<i64: 32, 12>}, {transform_indices = @transform_2, window_bounds = array<i64: 16, 12>}]} {
    %c0 = arith.constant 0 : index
    %c0_0 = arith.constant 0 : index
    %0 = vector.load %arg1[%c0, %c0_0] : memref<16x32xf32, #tpu.memory_space<vmem>>, vector<16x32xf32>
    %c0_1 = arith.constant 0 : index
    %c0_2 = arith.constant 0 : index
    %1 = vector.load %arg2[%c0_1, %c0_2] : memref<32x12xf32, #tpu.memory_space<vmem>>, vector<32x12xf32>
    %cst = arith.constant dense<0.000000e+00> : vector<16x12xf32>
    %2 = tpu.matmul %0, %1, %cst {dimension_numbers = #tpu.dot_dimension_numbers<[1], [0], [0], [1], [0, 0, 1, 1], [], []>} : vector<16x32xf32>, vector<32x12xf32>, vector<16x12xf32> -> vector<16x12xf32>
    %3 = arith.mulf %0, %0 : vector<16x32xf32>
    %cst_3 = arith.constant dense<0.000000e+00> : vector<16xf32>
    %4 = vector.multi_reduction <add>, %3, %cst_3 [1] : vector<16x32xf32> to vector<16xf32>
    %5 = vector.shape_cast %4 : vector<16xf32> to vector<16x1xf32>
    %cst_4 = arith.constant 1.000000e-24 : f32
    %6 = vector.broadcast %cst_4 : f32 to vector<16x1xf32>
    %7 = arith.maximumf %5, %6 : vector<16x1xf32>
    %8 = math.rsqrt %7 : vector<16x1xf32>
    %cst_5 = arith.constant 1.000000e+01 : f32
    %9 = vector.broadcast %cst_5 : f32 to vector<16x1xf32>
    %10 = arith.mulf %9, %8 : vector<16x1xf32>
    %11 = vector.broadcast %10 : vector<16x1xf32> to vector<16x12xf32>
    %12 = arith.mulf %2, %11 : vector<16x12xf32>
    %c0_6 = arith.constant 0 : index
    %c0_7 = arith.constant 0 : index
    %13 = vector.load %arg3[%c0_6, %c0_7] : memref<16x12xf32, #tpu.memory_space<vmem>>, vector<16x12xf32>
    tpu.vector_store %arg3[%c0_6, %c0_7], %12 {strides = array<i32>} : memref<16x12xf32, #tpu.memory_space<vmem>>, vector<16x12xf32>,
    return
  }
  func.func @transform_0(%arg0: i32) -> (i32, i32) {
    %c0_i32 = arith.constant 0 : i32
    %c0_i32_0 = arith.constant 0 : i32
    return %arg0, %c0_i32 : i32, i32
  }
  func.func @transform_1(%arg0: i32) -> (i32, i32) {
    %c0_i32 = arith.constant 0 : i32
    %c0_i32_0 = arith.constant 0 : i32
    %c0_i32_1 = arith.constant 0 : i32
    return %c0_i32, %c0_i32_0 : i32, i32
  }
  func.func @transform_2(%arg0: i32) -> (i32, i32) {
    %c0_i32 = arith.constant 0 : i32
    %c0_i32_0 = arith.constant 0 : i32
    return %arg0, %c0_i32 : i32, i32
  }
}

</mosaic_0001>

<bundles_post_ra>
// kernel: tpu_custom_call.1
= control target key start
LH: loop header
LB: loop body
LE: loop exit
PB: predicated region body
PF: predicated region fallthrough
CT: control target
= control target key end

     0   :  { %vm18_vm0 = vcmask 261120   ;;  %s245_s0 = inlined_call_operand.vmem [shape: f32[16,32], index: 0, kind: input, shape index: {}]   ;;  %s246_s1 = inlined_call_operand.vmem [shape: f32[32,12], index: 1, kind: input, shape index: {}]   ;;  %s247_s2 = inlined_call_operand.hbm [shape: f32[16,12], index: 2, kind: output, shape index: {}]  }
   0x1   :  { %v14_v0 = vld [vmem:[%s246_s1] sm:$0xff]  ;;  %v15_v1 = vld [vmem:[%s246_s1 + $0x8] sm:$0xff]  ;;  %v16_v2 = vld [vmem:[%s246_s1 + $0x10] sm:$0xff] }
   0x2   :  { %v154_v3 = vpack.c.bf16 %v15_v1, %v14_v0  ;;  %v17_v4 = vld [vmem:[%s246_s1 + $0x18] sm:$0xff]  ;;  %v12_v5 = vld [vmem:[%s245_s0] sm:$0xff]  ;;  %v13_v6 = vld [vmem:[%s245_s0 + $0x8] sm:$0xff] }
   0x3   :  { %v158_v7 = vpack.c.bf16 %v17_v4, %v16_v2  ;;  %151 = vmatprep.mubr.msk.f32.mxu0 %vm18_vm0, %v12_v5  ;;  %v100_v8 = vmul.f32 %v12_v5, %v12_v5  ;;  %v101_v9 = vmul.f32 %v13_v6, %v13_v6 }
   0x4   :  { %7 = vsyncpa [#allocation3], 0  ;;  %155 = vmatprep.subr.bf16.mxu0 %v154_v3  ;;  %s193_s0 = smov [#allocation2]   ;;  %vm116_vm1 = vcmask 97280  }
   0x5   :  { %157 = vmatpush3.bf16.msra.mxu0 %v154_v3  ;;  %v102_v10 = vsel %vm18_vm0, %v100_v8, 0.0  ;;  %v105_v11 = vsel %vm18_vm0, %v101_v9, 0.0  ;;  %s124_s1 = sshll.u32 %s193_s0, 4  ;;  %s125_s1 = int_to_ptr.vmem [resolvable:$true] %s124_s1 }
   0x6   :  { %159 = vmatprep.subr.bf16.mxu0 %v158_v7  ;;  %103 = vadd.xlane.f32.xlu0 %v102_v10  ;;  %s169_s21 = scalar_lea.vmem %s125_s1, 256  ;;  %p174_p1 = scmp.lt.s32.totalorder %s125_s1, %s125_s1 }
   0x7   :  { %p170_p0 = scmp.ne.s32.totalorder %s125_s1, %s169_s21  ;;  %p175_p2 = scmp.lt.s32.totalorder %s169_s21, %s169_s21 }
   0x9   :  { %161 = vmatpush3.bf16.msra.mxu0 %v158_v7  ;;  %p176_p3 = por %p175_p2, %p174_p1 }
   0xa   :  { %106 = vadd.xlane.f32.xlu0 %v105_v11 }
   0xb   :  { %p177_p4 = pnand %p176_p3, %p170_p0 }
   0xc   :  { %152 = vmatmul.mubr.msk.f32.vlgmr.msra.gmra.mrb[0].mxu0 %vm18_vm0, %v13_v6 }
  0x93   :  { %v104_v12 = vpop.xlane.xlu0 %103 }
  0x94   :  { %v108_v15 = vmax.f32 %v104_v12, 1e-24 }
  0x97   :  { %v107_v13 = vpop.xlane.xlu0 %106 }
  0x98   :  { %v109_v14 = vmax.f32 %v107_v13, 1e-24 }
  0x9a   :  { %165 = vrsqrt.f32 %v109_v14 }
  0x9b   :  { %167 = vrsqrt.f32 %v108_v15 }
  0xa4   :  { %v166_v16 = vpop.eup %165 }
  0xa5   :  { %v168_v17 = vpop.eup %167  ;;  %v113_v18 = vmul.f32 10.0, %v166_v16 }
  0xa6   :  { %v112_v20 = vmul.f32 10.0, %v168_v17 }
  0xdf   :  { %v153_v19 = vpop.f32.mrb[0].mxu0 }
  0xe0   :  { %v115_v21 = vmul.f32 %v153_v19, %v113_v18  ;;  %v91_v22 = vpop.f32.mrb[1].mxu0 }
  0xe1   :  { %v114_v23 = vmul.f32 %v112_v20, %v91_v22 }
  0xe2   :  { %118 = vst.msk [vmem:[#allocation2 + $0x8] sm:$0xff] %vm116_vm1, %v115_v21 }
  0xe3   :  { %117 = vst.msk [vmem:[#allocation2] sm:$0xff] %vm116_vm1, %v114_v23 }
  0xe4   :  { %180 = shalt.err (!%p177_p4)
}
  0xe5   :  { %s181_s24 = scalar_lea.hbm %s247_s2, 256 }
  0xe6   :  { %p182_p5 = scmp.ne.s32.totalorder %s247_s2, %s181_s24  ;;  %p185_p6 = scmp.lt.u32.totalorder %s181_s24, %s247_s2 }
  0xe8   :  { %p187_p7 = pnand %p185_p6, %p182_p5 }
  0xea   :  { %190 = shalt.err (!%p187_p7)
}
  0xeb   :  { %s194_s29 = smov 128   ;;  %s195_s30 = smov 8  }
  0xec   :  { %130 = dma.vmem_to_hbm [thread:$0]  %s125_s1, 256, %s247_s2, [#allocation3], %s194_s29, %s194_s29, %s195_s30  }
  0xed   :  { %191 = dma.done.wait [#allocation3], 256  }
  0xee   :  { %192 = vsyncadd [#allocation3], 4294967040 }
  0xef   :  { %134 = vsyncpa [#allocation3], 1 }

// kernel: tpu_custom_call.1
= control target key start
LH: loop header
LB: loop body
LE: loop exit
PB: predicated region body
PF: predicated region fallthrough
CT: control target
= control target key end

     0   :  { %vm18_vm0 = vcmask 261120   ;;  %s245_s0 = inlined_call_operand.vmem [shape: f32[16,32], index: 0, kind: input, shape index: {}]   ;;  %s246_s1 = inlined_call_operand.vmem [shape: f32[32,12], index: 1, kind: input, shape index: {}]   ;;  %s247_s2 = inlined_call_operand.hbm [shape: f32[16,12], index: 2, kind: output, shape index: {}]  }
   0x1   :  { %v14_v0 = vld [vmem:[%s246_s1] sm:$0xff]  ;;  %v15_v1 = vld [vmem:[%s246_s1 + $0x8] sm:$0xff]  ;;  %v16_v2 = vld [vmem:[%s246_s1 + $0x10] sm:$0xff] }
   0x2   :  { %v154_v3 = vpack.c.bf16 %v15_v1, %v14_v0  ;;  %v17_v4 = vld [vmem:[%s246_s1 + $0x18] sm:$0xff]  ;;  %v12_v5 = vld [vmem:[%s245_s0] sm:$0xff]  ;;  %v13_v6 = vld [vmem:[%s245_s0 + $0x8] sm:$0xff] }
   0x3   :  { %v158_v7 = vpack.c.bf16 %v17_v4, %v16_v2  ;;  %151 = vmatprep.mubr.msk.f32.mxu0 %vm18_vm0, %v12_v5  ;;  %v100_v8 = vmul.f32 %v12_v5, %v12_v5  ;;  %v101_v9 = vmul.f32 %v13_v6, %v13_v6 }
   0x4   :  { %7 = vsyncpa [#allocation3], 0  ;;  %155 = vmatprep.subr.bf16.mxu0 %v154_v3  ;;  %s193_s0 = smov [#allocation2]   ;;  %vm116_vm1 = vcmask 97280  }
   0x5   :  { %157 = vmatpush3.bf16.msra.mxu0 %v154_v3  ;;  %v102_v10 = vsel %vm18_vm0, %v100_v8, 0.0  ;;  %v105_v11 = vsel %vm18_vm0, %v101_v9, 0.0  ;;  %s124_s1 = sshll.u32 %s193_s0, 4  ;;  %s125_s1 = int_to_ptr.vmem [resolvable:$true] %s124_s1 }
   0x6   :  { %159 = vmatprep.subr.bf16.mxu0 %v158_v7  ;;  %103 = vadd.xlane.f32.xlu0 %v102_v10  ;;  %s169_s21 = scalar_lea.vmem %s125_s1, 256  ;;  %p174_p1 = scmp.lt.s32.totalorder %s125_s1, %s125_s1 }
   0x7   :  { %p170_p0 = scmp.ne.s32.totalorder %s125_s1, %s169_s21  ;;  %p175_p2 = scmp.lt.s32.totalorder %s169_s21, %s169_s21 }
   0x9   :  { %161 = vmatpush3.bf16.msra.mxu0 %v158_v7  ;;  %p176_p3 = por %p175_p2, %p174_p1 }
   0xa   :  { %106 = vadd.xlane.f32.xlu0 %v105_v11 }
   0xb   :  { %p177_p4 = pnand %p176_p3, %p170_p0 }
   0xc   :  { %152 = vmatmul.mubr.msk.f32.vlgmr.msra.gmra.mrb[0].mxu0 %vm18_vm0, %v13_v6 }
  0x93   :  { %v104_v12 = vpop.xlane.xlu0 %103 }
  0x94   :  { %v108_v15 = vmax.f32 %v104_v12, 1e-24 }
  0x97   :  { %v107_v13 = vpop.xlane.xlu0 %106 }
  0x98   :  { %v109_v14 = vmax.f32 %v107_v13, 1e-24 }
  0x9a   :  { %165 = vrsqrt.f32 %v109_v14 }
  0x9b   :  { %167 = vrsqrt.f32 %v108_v15 }
  0xa4   :  { %v166_v16 = vpop.eup %165 }
  0xa5   :  { %v168_v17 = vpop.eup %167  ;;  %v113_v18 = vmul.f32 10.0, %v166_v16 }
  0xa6   :  { %v112_v20 = vmul.f32 10.0, %v168_v17 }
  0xdf   :  { %v153_v19 = vpop.f32.mrb[0].mxu0 }
  0xe0   :  { %v115_v21 = vmul.f32 %v153_v19, %v113_v18  ;;  %v91_v22 = vpop.f32.mrb[1].mxu0 }
  0xe1   :  { %v114_v23 = vmul.f32 %v112_v20, %v91_v22 }
  0xe2   :  { %118 = vst.msk [vmem:[#allocation2 + $0x8] sm:$0xff] %vm116_vm1, %v115_v21 }
  0xe3   :  { %117 = vst.msk [vmem:[#allocation2] sm:$0xff] %vm116_vm1, %v114_v23 }
  0xe4   :  { %180 = shalt.err (!%p177_p4)
}
  0xe5   :  { %s181_s24 = scalar_lea.hbm %s247_s2, 256 }
  0xe6   :  { %p182_p5 = scmp.ne.s32.totalorder %s247_s2, %s181_s24  ;;  %p185_p6 = scmp.lt.u32.totalorder %s181_s24, %s247_s2 }
  0xe8   :  { %p187_p7 = pnand %p185_p6, %p182_p5 }
  0xea   :  { %190 = shalt.err (!%p187_p7)
}
  0xeb   :  { %s194_s29 = smov 128   ;;  %s195_s30 = smov 8  }
  0xec   :  { %130 = dma.vmem_to_hbm [thread:$0]  %s125_s1, 256, %s247_s2, [#allocation3], %s194_s29, %s194_s29, %s195_s30  }
  0xed   :  { %191 = dma.done.wait [#allocation3], 256  }
  0xee   :  { %192 = vsyncadd [#allocation3], 4294967040 }
  0xef   :  { %134 = vsyncpa [#allocation3], 1 }

</bundles_post_ra>
